<compile_context>
chip_gen: v5e
topology: v5e:2x2
jax: 0.10.0
libtpu: 0.0.40
codegen_flags: <defaults>
</compile_context>

<pallas_src>
from types import SimpleNamespace

import jax
import jax.numpy as jnp
from jax.experimental import pallas as pl
from jax.experimental.pallas import tpu as pltpu


_SLAB = 128          # lane-dense packed-output width
_MAX_REL_TILE = 512  # relation rows per grid tile


def _round_up(x, m):
    return ((x + m - 1) // m) * m


# ----------------------------------------------------------------------------
# Fused kernel: object softmax/argmax + relation softmax/argmax + triplet score
# ----------------------------------------------------------------------------
def _fused_kernel(obj_ref, rel_ref, pair_ref,
                  obj_probs_ref, obj_slab_ref, rel_probs_ref, rel_slab_ref,
                  obj_score_scr):
    """grid = (B, NT); axis 0 = image ("parallel"), axis 1 = rel tile ("arbitrary")."""
    t = pl.program_id(1)
    no = obj_score_scr.shape[0]

    # ------------------ object head: once per image (t == 0) ------------------
    @pl.when(t == 0)
    def _():
        logits = obj_ref[0].astype(jnp.float32)                    # (NO, CO)
        co = logits.shape[-1]
        m = jnp.max(logits, axis=-1, keepdims=True)
        e = jnp.exp(logits - m)
        denom = jnp.sum(e, axis=-1, keepdims=True)
        probs = e * pl.reciprocal(denom, approx=True)              # EUP recip
        col = jax.lax.broadcasted_iota(jnp.int32, probs.shape, 1)
        probs = jnp.where(col == 0, 0.0, probs)                    # bg prob = 0
        obj_probs_ref[0] = probs
        mx = jnp.max(probs, axis=-1, keepdims=True)                # (NO, 1) obj_scores
        # argmax over classes >= 1 (column 0 explicitly excluded)
        cand = jnp.where((probs == mx) & (col >= 1), col, co)
        labels = jnp.min(cand, axis=-1, keepdims=True)             # (NO, 1) obj class
        obj_score_scr[...] = mx                                    # persist for rel tiles
        # lane-dense packed output: lane 0 = score, lane 1 = label
        lane = jax.lax.broadcasted_iota(jnp.int32, (no, _SLAB), 1)
        obj_slab_ref[0] = jnp.where(
            lane == 0, mx,
            jnp.where(lane == 1, labels.astype(jnp.float32), 0.0))

    # ------------------ relation head: every tile ------------------
    rlogits = rel_ref[0].astype(jnp.float32)                       # (TR, CR)
    tr, cr = rlogits.shape
    m = jnp.max(rlogits, axis=-1, keepdims=True)
    e = jnp.exp(rlogits - m)
    denom = jnp.sum(e, axis=-1, keepdims=True)
    rprobs = e * pl.reciprocal(denom, approx=True)
    rel_probs_ref[0] = rprobs                                      # NOT bg-zeroed (matches ref)
    rcol = jax.lax.broadcasted_iota(jnp.int32, rprobs.shape, 1)
    masked = jnp.where(rcol == 0, 0.0, rprobs)                     # restrict to classes 1:
    rmx = jnp.max(masked, axis=-1, keepdims=True)                  # (TR, 1) rel_scores
    rcand = jnp.where((masked == rmx) & (rcol >= 1), rcol, cr)
    rlabels = jnp.min(rcand, axis=-1, keepdims=True)               # (TR, 1) rel class

    # in-kernel gather of subject/object scores: exact one-hot MXU matmul
    pairs = pair_ref[0]                                            # (TR, 2) int32
    idx0 = pairs[:, 0:1]
    idx1 = pairs[:, 1:2]
    obj_lane = jax.lax.broadcasted_iota(jnp.int32, (tr, no), 1)
    oh0 = (obj_lane == idx0).astype(jnp.float32)                   # (TR, NO)
    oh1 = (obj_lane == idx1).astype(jnp.float32)
    scores_b = jnp.broadcast_to(obj_score_scr[...], (no, _SLAB))   # (NO, 128)
    s0 = jnp.dot(oh0, scores_b, preferred_element_type=jnp.float32)[:, 0:1]
    s1 = jnp.dot(oh1, scores_b, preferred_element_type=jnp.float32)[:, 0:1]
    trip = rmx * s0 * s1                                           # (TR, 1)

    lane = jax.lax.broadcasted_iota(jnp.int32, (tr, _SLAB), 1)
    rel_slab_ref[0] = jnp.where(
        lane == 0, rlabels.astype(jnp.float32),
        jnp.where(lane == 1, trip, 0.0))


# ----------------------------------------------------------------------------
# Batched Pallas wrapper
# ----------------------------------------------------------------------------
def _batched_postprocess(obj_stack, rel_stack, pair_stack):
    B, NO, CO = obj_stack.shape
    _, NR, CR = rel_stack.shape
    TR = NR if NR <= _MAX_REL_TILE else _MAX_REL_TILE
    assert NO % 8 == 0 and TR % 8 == 0 and NR % TR == 0
    NT = NR // TR

    return pl.pallas_call(
        _fused_kernel,
        grid=(B, NT),
        in_specs=[
            pl.BlockSpec((1, NO, CO), lambda b, t: (b, 0, 0)),      # obj logits
            pl.BlockSpec((1, TR, CR), lambda b, t: (b, t, 0)),      # rel logits
            pl.BlockSpec((1, TR, 2), lambda b, t: (b, t, 0)),       # pair idx
        ],
        out_specs=(
            pl.BlockSpec((1, NO, CO), lambda b, t: (b, 0, 0)),      # obj probs
            pl.BlockSpec((1, NO, _SLAB), lambda b, t: (b, 0, 0)),   # obj score/label slab
            pl.BlockSpec((1, TR, CR), lambda b, t: (b, t, 0)),      # rel probs
            pl.BlockSpec((1, TR, _SLAB), lambda b, t: (b, t, 0)),   # rel label/triplet slab
        ),
        out_shape=(
            jax.ShapeDtypeStruct((B, NO, CO), jnp.float32),
            jax.ShapeDtypeStruct((B, NO, _SLAB), jnp.float32),
            jax.ShapeDtypeStruct((B, NR, CR), jnp.float32),
            jax.ShapeDtypeStruct((B, NR, _SLAB), jnp.float32),
        ),
        scratch_shapes=[pltpu.VMEM((NO, 1), jnp.float32)],
        compiler_params=pltpu.CompilerParams(
            dimension_semantics=("parallel", "arbitrary")),
    )(obj_stack, rel_stack, pair_stack)


# ----------------------------------------------------------------------------
# PostProcessor.forward equivalent
# ----------------------------------------------------------------------------
def post_processor_forward(det_result, key_first=False):
    if det_result.refine_scores is None:
        return det_result
    relation_logits = det_result.rel_scores
    finetune_obj_logits = det_result.refine_scores
    rel_pair_idxes = det_result.rel_pair_idxes
    ranking_scores = det_result.ranking_scores

    B = len(relation_logits)
    n_objs = [int(x.shape[0]) for x in finetune_obj_logits]
    n_rels = [int(x.shape[0]) for x in relation_logits]

    NO = _round_up(max(n_objs), 8)
    max_nr = max(max(n_rels), 1)
    NR = _round_up(max_nr, 8) if max_nr <= _MAX_REL_TILE else _round_up(max_nr, _MAX_REL_TILE)

    def pad_rows(x, n_pad):
        n = x.shape[0]
        if n == n_pad:
            return x
        return jnp.pad(x, [(0, n_pad - n)] + [(0, 0)] * (x.ndim - 1))

    obj_stack = jnp.stack([pad_rows(o.astype(jnp.float32), NO) for o in finetune_obj_logits])
    rel_stack = jnp.stack([pad_rows(r.astype(jnp.float32), NR) for r in relation_logits])
    pair_stack = jnp.stack([pad_rows(p.astype(jnp.int32), NR) for p in rel_pair_idxes])

    obj_probs_b, obj_slab_b, rel_probs_b, rel_slab_b = _batched_postprocess(
        obj_stack, rel_stack, pair_stack)

    finetune_labels, finetune_dists, finetune_bboxes = [], [], []
    rels, rel_dists = [], []
    prop_rel_pair_idxes, prop_rel_labels, prop_rel_scores = [], [], []
    triplet_scores = []
    prop_ranking_scores = None if ranking_scores is None else []

    for i in range(B):
        no, nr = n_objs[i], n_rels[i]
        obj_probs = obj_probs_b[i, :no]
        obj_scores = obj_slab_b[i, :no, 0]
        obj_labels = obj_slab_b[i, :no, 1].astype(jnp.int32)
        rel_probs = rel_probs_b[i, :nr]
        rel_labels = rel_slab_b[i, :nr, 0].astype(jnp.int32)
        triple_scores = rel_slab_b[i, :nr, 1]

        finetune_labels.append(obj_labels)
        finetune_dists.append(obj_probs)

        bbox = det_result.bboxes[i].astype(jnp.float32)
        if bbox.shape[1] == 4:
            bbox = jnp.concatenate([bbox, obj_scores[:, None]], axis=-1)
        else:
            bbox = bbox.at[:, -1].set(obj_scores)
        finetune_bboxes.append(bbox)

        rel_pair_idx = rel_pair_idxes[i]
        rel_logit = relation_logits[i]

        if key_first and ranking_scores is not None:
            triple_scores = triple_scores * ranking_scores[i].reshape(-1)

        # TODO(synk): descending sort / top-100 selection has no clean Pallas
        # TPU equivalent; it stays in plain JAX.
        sorting_idx = jnp.argsort(-triple_scores)
        triple_scores = triple_scores[sorting_idx]
        rel_pair_idx_s = rel_pair_idx[sorting_idx][:100]
        rel_probs_s = rel_probs[sorting_idx][:100]
        rel_labels_s = rel_labels[sorting_idx][:100]
        rel_logit_s = rel_logit[sorting_idx][:100]
        if key_first and ranking_scores is not None:
            prop_ranking_scores.append(ranking_scores[i][sorting_idx])

        prop_rel_pair_idxes.append(rel_pair_idx_s)
        prop_rel_labels.append(rel_labels_s)
        prop_rel_scores.append(rel_logit_s)
        rels.append(jnp.concatenate(
            [rel_pair_idx_s,
             rel_labels_s[:, None].astype(rel_pair_idx_s.dtype)], axis=-1))
        rel_dists.append(rel_probs_s)
        triplet_scores.append(triple_scores)

    det_result.refine_bboxes = finetune_bboxes
    det_result.refine_dists = finetune_dists
    det_result.refine_labels = finetune_labels
    det_result.rels = rels
    det_result.rel_dists = rel_dists
    det_result.rel_pair_idxes = prop_rel_pair_idxes
    det_result.triplet_scores = triplet_scores
    det_result.rel_labels = prop_rel_labels
    det_result.rel_scores = prop_rel_scores
    det_result.ranking_scores = prop_ranking_scores
    return det_result


# ----------------------------------------------------------------------------
# Demo
# ----------------------------------------------------------------------------
if __name__ == "__main__":
    key = jax.random.PRNGKey(0)
    num_images = 2
    n_obj, c_obj = 8, 16          # objects per image, object classes (incl bg)
    n_rel, c_rel = 16, 8          # relation pairs per image, rel classes (incl bg)

    rel_scores, refine_scores, rel_pair_idxes, bboxes, ranking = [], [], [], [], []
    for _ in range(num_images):
        key, k1, k2, k3, k4, k5 = jax.random.split(key, 6)
        refine_scores.append(jax.random.normal(k1, (n_obj, c_obj), jnp.float32))
        rel_scores.append(jax.random.normal(k2, (n_rel, c_rel), jnp.float32))
        rel_pair_idxes.append(
            jax.random.randint(k3, (n_rel, 2), 0, n_obj, dtype=jnp.int32))
        bboxes.append(jax.random.uniform(k4, (n_obj, 4), jnp.float32) * 100.0)
        ranking.append(jax.random.uniform(k5, (n_rel,), jnp.float32))

    det_result = SimpleNamespace(
        rel_scores=rel_scores,
        refine_scores=refine_scores,
        rel_pair_idxes=rel_pair_idxes,
        bboxes=bboxes,
        ranking_scores=ranking,
    )

    out = post_processor_forward(det_result, key_first=False)

    # block on every produced array
    leaves = (out.refine_bboxes + out.refine_dists + out.refine_labels +
              out.rels + out.rel_dists + out.rel_pair_idxes +
              out.triplet_scores + out.rel_labels + out.rel_scores)
    for leaf in leaves:
        jax.block_until_ready(leaf)

    # sanity checks
    assert out.refine_bboxes[0].shape == (n_obj, 5)
    assert out.rels[0].shape == (min(100, n_rel), 3)
    assert out.triplet_scores[0].shape == (min(100, n_rel),)
    # self-consistency: kernel argmax matches argmax over the kernel's own probs
    ref_obj_labels = jnp.argmax(out.refine_dists[0][:, 1:], axis=1) + 1
    assert bool(jnp.all(out.refine_labels[0] == ref_obj_labels.astype(jnp.int32)))
    assert bool(jnp.all(out.refine_labels[0] >= 1))
    assert bool(jnp.all(out.rel_labels[0] >= 1))
    print("KERNEL_OK")
</pallas_src>

<mosaic_0001>
module attributes {stable_mosaic.version = 11 : i64} {
  func.func @_fused_kernel(%arg0: i32, %arg1: i32, %arg2: memref<1x8x16xf32, #tpu.memory_space<vmem>>, %arg3: memref<1x16x8xf32, #tpu.memory_space<vmem>>, %arg4: memref<1x16x2xi32, #tpu.memory_space<vmem>>, %arg5: memref<1x8x16xf32, #tpu.memory_space<vmem>>, %arg6: memref<1x8x128xf32, #tpu.memory_space<vmem>>, %arg7: memref<1x16x8xf32, #tpu.memory_space<vmem>>, %arg8: memref<1x16x128xf32, #tpu.memory_space<vmem>>, %arg9: memref<8x1xf32, #tpu.memory_space<vmem>>) attributes {dimension_semantics = [#tpu.dimension_semantics<parallel>, #tpu.dimension_semantics<arbitrary>], iteration_bounds = array<i64: 2, 1>, scalar_prefetch = 0 : i64, scratch_operands = 1 : i64, tpu.core_type = #tpu.core_type<tc>, window_params = [{transform_indices = @transform_0, window_bounds = array<i64: 1, 8, 16>}, {transform_indices = @transform_1, window_bounds = array<i64: 1, 16, 8>}, {transform_indices = @transform_2, window_bounds = array<i64: 1, 16, 2>}, {transform_indices = @transform_3, window_bounds = array<i64: 1, 8, 16>}, {transform_indices = @transform_4, window_bounds = array<i64: 1, 8, 128>}, {transform_indices = @transform_5, window_bounds = array<i64: 1, 16, 8>}, {transform_indices = @transform_6, window_bounds = array<i64: 1, 16, 128>}]} {
    %c0_i32 = arith.constant 0 : i32
    %0 = arith.cmpi eq, %arg1, %c0_i32 : i32
    %1 = arith.extui %0 : i1 to i32
    %c0_i32_0 = arith.constant 0 : i32
    %2 = arith.cmpi ne, %1, %c0_i32_0 : i32
    scf.if %2 {
      %c0_24 = arith.constant 0 : index
      %c0_25 = arith.constant 0 : index
      %c0_26 = arith.constant 0 : index
      %72 = vector.load %arg2[%c0_24, %c0_25, %c0_26] : memref<1x8x16xf32, #tpu.memory_space<vmem>>, vector<1x8x16xf32>
      %73 = vector.shape_cast %72 : vector<1x8x16xf32> to vector<8x16xf32>
      %cst_27 = arith.constant dense<0xFF800000> : vector<8xf32>
      %74 = vector.multi_reduction <maximumf>, %73, %cst_27 [1] : vector<8x16xf32> to vector<8xf32>
      %75 = vector.shape_cast %74 : vector<8xf32> to vector<8x1xf32>
      %76 = vector.broadcast %75 : vector<8x1xf32> to vector<8x16xf32>
      %77 = arith.subf %73, %76 : vector<8x16xf32>
      %78 = math.exp %77 : vector<8x16xf32>
      %cst_28 = arith.constant dense<0.000000e+00> : vector<8xf32>
      %79 = vector.multi_reduction <add>, %78, %cst_28 [1] : vector<8x16xf32> to vector<8xf32>
      %80 = vector.shape_cast %79 : vector<8xf32> to vector<8x1xf32>
      %81 = tpu.reciprocal %80 {approx = true} : vector<8x1xf32> -> vector<8x1xf32>
      %82 = vector.broadcast %81 : vector<8x1xf32> to vector<8x16xf32>
      %83 = arith.mulf %78, %82 : vector<8x16xf32>
      %84 = tpu.iota {dimensions = array<i32: 1>} : vector<8x16xi32>
      %c0_i32_29 = arith.constant 0 : i32
      %85 = vector.broadcast %c0_i32_29 : i32 to vector<8x16xi32>
      %86 = arith.cmpi eq, %84, %85 : vector<8x16xi32>
      %cst_30 = arith.constant 0.000000e+00 : f32
      %87 = vector.broadcast %cst_30 : f32 to vector<8x16xf32>
      %88 = arith.select %86, %87, %83 : vector<8x16xi1>, vector<8x16xf32>
      %c0_31 = arith.constant 0 : index
      %c0_32 = arith.constant 0 : index
      %c0_33 = arith.constant 0 : index
      %89 = vector.load %arg5[%c0_31, %c0_32, %c0_33] : memref<1x8x16xf32, #tpu.memory_space<vmem>>, vector<1x8x16xf32>
      %90 = vector.shape_cast %89 : vector<1x8x16xf32> to vector<8x16xf32>
      %91 = vector.shape_cast %88 : vector<8x16xf32> to vector<1x8x16xf32>
      tpu.vector_store %arg5[%c0_31, %c0_32, %c0_33], %91 {strides = array<i32>} : memref<1x8x16xf32, #tpu.memory_space<vmem>>, vector<1x8x16xf32>,
      %cst_34 = arith.constant dense<0xFF800000> : vector<8xf32>
      %92 = vector.multi_reduction <maximumf>, %88, %cst_34 [1] : vector<8x16xf32> to vector<8xf32>
      %93 = vector.shape_cast %92 : vector<8xf32> to vector<8x1xf32>
      %94 = vector.broadcast %93 : vector<8x1xf32> to vector<8x16xf32>
      %95 = arith.cmpf oeq, %88, %94 : vector<8x16xf32>
      %c1_i32_35 = arith.constant 1 : i32
      %96 = vector.broadcast %c1_i32_35 : i32 to vector<8x16xi32>
      %97 = arith.cmpi sge, %84, %96 : vector<8x16xi32>
      %98 = arith.andi %95, %97 : vector<8x16xi1>
      %c16_i32 = arith.constant 16 : i32
      %99 = vector.broadcast %c16_i32 : i32 to vector<8x16xi32>
      %100 = arith.select %98, %84, %99 : vector<8x16xi1>, vector<8x16xi32>
      %cst_36 = arith.constant dense<2147483647> : vector<8xi32>
      %101 = vector.multi_reduction <minsi>, %100, %cst_36 [1] : vector<8x16xi32> to vector<8xi32>
      %102 = vector.shape_cast %101 : vector<8xi32> to vector<8x1xi32>
      %c0_37 = arith.constant 0 : index
      %c0_38 = arith.constant 0 : index
      %103 = vector.load %arg9[%c0_37, %c0_38] : memref<8x1xf32, #tpu.memory_space<vmem>>, vector<8x1xf32>
      tpu.vector_store %arg9[%c0_37, %c0_38], %93 {strides = array<i32>} : memref<8x1xf32, #tpu.memory_space<vmem>>, vector<8x1xf32>,
      %104 = tpu.iota {dimensions = array<i32: 1>} : vector<8x128xi32>
      %c0_i32_39 = arith.constant 0 : i32
      %105 = vector.broadcast %c0_i32_39 : i32 to vector<8x128xi32>
      %106 = arith.cmpi eq, %104, %105 : vector<8x128xi32>
      %c1_i32_40 = arith.constant 1 : i32
      %107 = vector.broadcast %c1_i32_40 : i32 to vector<8x128xi32>
      %108 = arith.cmpi eq, %104, %107 : vector<8x128xi32>
      %109 = arith.sitofp %102 : vector<8x1xi32> to vector<8x1xf32>
      %cst_41 = arith.constant 0.000000e+00 : f32
      %110 = vector.shape_cast %109 : vector<8x1xf32> to vector<8x1xf32>
      %111 = vector.broadcast %110 : vector<8x1xf32> to vector<8x128xf32>
      %112 = vector.broadcast %cst_41 : f32 to vector<8x128xf32>
      %113 = arith.select %108, %111, %112 : vector<8x128xi1>, vector<8x128xf32>
      %114 = vector.shape_cast %93 : vector<8x1xf32> to vector<8x1xf32>
      %115 = vector.broadcast %114 : vector<8x1xf32> to vector<8x128xf32>
      %116 = arith.select %106, %115, %113 : vector<8x128xi1>, vector<8x128xf32>
      %c0_42 = arith.constant 0 : index
      %c0_43 = arith.constant 0 : index
      %c0_44 = arith.constant 0 : index
      %117 = vector.load %arg6[%c0_42, %c0_43, %c0_44] : memref<1x8x128xf32, #tpu.memory_space<vmem>>, vector<1x8x128xf32>
      %118 = vector.shape_cast %117 : vector<1x8x128xf32> to vector<8x128xf32>
      %119 = vector.shape_cast %116 : vector<8x128xf32> to vector<1x8x128xf32>
      tpu.vector_store %arg6[%c0_42, %c0_43, %c0_44], %119 {strides = array<i32>} : memref<1x8x128xf32, #tpu.memory_space<vmem>>, vector<1x8x128xf32>,
    } else {
    }
    %c0 = arith.constant 0 : index
    %c0_1 = arith.constant 0 : index
    %c0_2 = arith.constant 0 : index
    %3 = vector.load %arg3[%c0, %c0_1, %c0_2] : memref<1x16x8xf32, #tpu.memory_space<vmem>>, vector<1x16x8xf32>
    %4 = vector.shape_cast %3 : vector<1x16x8xf32> to vector<16x8xf32>
    %cst = arith.constant dense<0xFF800000> : vector<16xf32>
    %5 = vector.multi_reduction <maximumf>, %4, %cst [1] : vector<16x8xf32> to vector<16xf32>
    %6 = vector.shape_cast %5 : vector<16xf32> to vector<16x1xf32>
    %7 = vector.broadcast %6 : vector<16x1xf32> to vector<16x8xf32>
    %8 = arith.subf %4, %7 : vector<16x8xf32>
    %9 = math.exp %8 : vector<16x8xf32>
    %cst_3 = arith.constant dense<0.000000e+00> : vector<16xf32>
    %10 = vector.multi_reduction <add>, %9, %cst_3 [1] : vector<16x8xf32> to vector<16xf32>
    %11 = vector.shape_cast %10 : vector<16xf32> to vector<16x1xf32>
    %12 = tpu.reciprocal %11 {approx = true} : vector<16x1xf32> -> vector<16x1xf32>
    %13 = vector.broadcast %12 : vector<16x1xf32> to vector<16x8xf32>
    %14 = arith.mulf %9, %13 : vector<16x8xf32>
    %c0_4 = arith.constant 0 : index
    %c0_5 = arith.constant 0 : index
    %c0_6 = arith.constant 0 : index
    %15 = vector.load %arg7[%c0_4, %c0_5, %c0_6] : memref<1x16x8xf32, #tpu.memory_space<vmem>>, vector<1x16x8xf32>
    %16 = vector.shape_cast %15 : vector<1x16x8xf32> to vector<16x8xf32>
    %17 = vector.shape_cast %14 : vector<16x8xf32> to vector<1x16x8xf32>
    tpu.vector_store %arg7[%c0_4, %c0_5, %c0_6], %17 {strides = array<i32>} : memref<1x16x8xf32, #tpu.memory_space<vmem>>, vector<1x16x8xf32>,
    %18 = tpu.iota {dimensions = array<i32: 1>} : vector<16x8xi32>
    %c0_i32_7 = arith.constant 0 : i32
    %19 = vector.broadcast %c0_i32_7 : i32 to vector<16x8xi32>
    %20 = arith.cmpi eq, %18, %19 : vector<16x8xi32>
    %cst_8 = arith.constant 0.000000e+00 : f32
    %21 = vector.broadcast %cst_8 : f32 to vector<16x8xf32>
    %22 = arith.select %20, %21, %14 : vector<16x8xi1>, vector<16x8xf32>
    %cst_9 = arith.constant dense<0xFF800000> : vector<16xf32>
    %23 = vector.multi_reduction <maximumf>, %22, %cst_9 [1] : vector<16x8xf32> to vector<16xf32>
    %24 = vector.shape_cast %23 : vector<16xf32> to vector<16x1xf32>
    %25 = vector.broadcast %24 : vector<16x1xf32> to vector<16x8xf32>
    %26 = arith.cmpf oeq, %22, %25 : vector<16x8xf32>
    %c1_i32 = arith.constant 1 : i32
    %27 = vector.broadcast %c1_i32 : i32 to vector<16x8xi32>
    %28 = arith.cmpi sge, %18, %27 : vector<16x8xi32>
    %29 = arith.andi %26, %28 : vector<16x8xi1>
    %c8_i32 = arith.constant 8 : i32
    %30 = vector.broadcast %c8_i32 : i32 to vector<16x8xi32>
    %31 = arith.select %29, %18, %30 : vector<16x8xi1>, vector<16x8xi32>
    %cst_10 = arith.constant dense<2147483647> : vector<16xi32>
    %32 = vector.multi_reduction <minsi>, %31, %cst_10 [1] : vector<16x8xi32> to vector<16xi32>
    %33 = vector.shape_cast %32 : vector<16xi32> to vector<16x1xi32>
    %c0_11 = arith.constant 0 : index
    %c0_12 = arith.constant 0 : index
    %c0_13 = arith.constant 0 : index
    %34 = vector.load %arg4[%c0_11, %c0_12, %c0_13] : memref<1x16x2xi32, #tpu.memory_space<vmem>>, vector<1x16x2xi32>
    %35 = vector.shape_cast %34 : vector<1x16x2xi32> to vector<16x2xi32>
    %36 = vector.extract_strided_slice %35 {offsets = [0, 0], sizes = [16, 1], strides = [1, 1]} : vector<16x2xi32> to vector<16x1xi32>
    %37 = vector.extract_strided_slice %35 {offsets = [0, 1], sizes = [16, 1], strides = [1, 1]} : vector<16x2xi32> to vector<16x1xi32>
    %38 = tpu.iota {dimensions = array<i32: 1>} : vector<16x8xi32>
    %39 = vector.broadcast %36 : vector<16x1xi32> to vector<16x8xi32>
    %40 = arith.cmpi eq, %38, %39 : vector<16x8xi32>
    %41 = arith.extui %40 : vector<16x8xi1> to vector<16x8xi32>
    %42 = arith.sitofp %41 : vector<16x8xi32> to vector<16x8xf32>
    %43 = vector.broadcast %37 : vector<16x1xi32> to vector<16x8xi32>
    %44 = arith.cmpi eq, %38, %43 : vector<16x8xi32>
    %45 = arith.extui %44 : vector<16x8xi1> to vector<16x8xi32>
    %46 = arith.sitofp %45 : vector<16x8xi32> to vector<16x8xf32>
    %c0_14 = arith.constant 0 : index
    %c0_15 = arith.constant 0 : index
    %47 = vector.load %arg9[%c0_14, %c0_15] : memref<8x1xf32, #tpu.memory_space<vmem>>, vector<8x1xf32>
    %48 = vector.shape_cast %47 : vector<8x1xf32> to vector<8x1xf32>
    %49 = vector.broadcast %48 : vector<8x1xf32> to vector<8x128xf32>
    %cst_16 = arith.constant dense<0.000000e+00> : vector<16x128xf32>
    %50 = tpu.matmul %42, %49, %cst_16 {dimension_numbers = #tpu.dot_dimension_numbers<[1], [0], [0], [1], [0, 0, 1, 1], [], []>} : vector<16x8xf32>, vector<8x128xf32>, vector<16x128xf32> -> vector<16x128xf32>
    %51 = vector.extract_strided_slice %50 {offsets = [0, 0], sizes = [16, 1], strides = [1, 1]} : vector<16x128xf32> to vector<16x1xf32>
    %cst_17 = arith.constant dense<0.000000e+00> : vector<16x128xf32>
    %52 = tpu.matmul %46, %49, %cst_17 {dimension_numbers = #tpu.dot_dimension_numbers<[1], [0], [0], [1], [0, 0, 1, 1], [], []>} : vector<16x8xf32>, vector<8x128xf32>, vector<16x128xf32> -> vector<16x128xf32>
    %53 = vector.extract_strided_slice %52 {offsets = [0, 0], sizes = [16, 1], strides = [1, 1]} : vector<16x128xf32> to vector<16x1xf32>
    %54 = arith.mulf %24, %51 : vector<16x1xf32>
    %55 = arith.mulf %54, %53 : vector<16x1xf32>
    %56 = tpu.iota {dimensions = array<i32: 1>} : vector<16x128xi32>
    %c0_i32_18 = arith.constant 0 : i32
    %57 = vector.broadcast %c0_i32_18 : i32 to vector<16x128xi32>
    %58 = arith.cmpi eq, %56, %57 : vector<16x128xi32>
    %59 = arith.sitofp %33 : vector<16x1xi32> to vector<16x1xf32>
    %c1_i32_19 = arith.constant 1 : i32
    %60 = vector.broadcast %c1_i32_19 : i32 to vector<16x128xi32>
    %61 = arith.cmpi eq, %56, %60 : vector<16x128xi32>
    %cst_20 = arith.constant 0.000000e+00 : f32
    %62 = vector.shape_cast %55 : vector<16x1xf32> to vector<16x1xf32>
    %63 = vector.broadcast %62 : vector<16x1xf32> to vector<16x128xf32>
    %64 = vector.broadcast %cst_20 : f32 to vector<16x128xf32>
    %65 = arith.select %61, %63, %64 : vector<16x128xi1>, vector<16x128xf32>
    %66 = vector.shape_cast %59 : vector<16x1xf32> to vector<16x1xf32>
    %67 = vector.broadcast %66 : vector<16x1xf32> to vector<16x128xf32>
    %68 = arith.select %58, %67, %65 : vector<16x128xi1>, vector<16x128xf32>
    %c0_21 = arith.constant 0 : index
    %c0_22 = arith.constant 0 : index
    %c0_23 = arith.constant 0 : index
    %69 = vector.load %arg8[%c0_21, %c0_22, %c0_23] : memref<1x16x128xf32, #tpu.memory_space<vmem>>, vector<1x16x128xf32>
    %70 = vector.shape_cast %69 : vector<1x16x128xf32> to vector<16x128xf32>
    %71 = vector.shape_cast %68 : vector<16x128xf32> to vector<1x16x128xf32>
    tpu.vector_store %arg8[%c0_21, %c0_22, %c0_23], %71 {strides = array<i32>} : memref<1x16x128xf32, #tpu.memory_space<vmem>>, vector<1x16x128xf32>,
    return
  }
  func.func @transform_0(%arg0: i32, %arg1: i32) -> (i32, i32, i32) {
    %c0_i32 = arith.constant 0 : i32
    %c0_i32_0 = arith.constant 0 : i32
    %c0_i32_1 = arith.constant 0 : i32
    return %arg0, %c0_i32, %c0_i32_0 : i32, i32, i32
  }
  func.func @transform_1(%arg0: i32, %arg1: i32) -> (i32, i32, i32) {
    %c0_i32 = arith.constant 0 : i32
    %c0_i32_0 = arith.constant 0 : i32
    return %arg0, %arg1, %c0_i32 : i32, i32, i32
  }
  func.func @transform_2(%arg0: i32, %arg1: i32) -> (i32, i32, i32) {
    %c0_i32 = arith.constant 0 : i32
    %c0_i32_0 = arith.constant 0 : i32
    return %arg0, %arg1, %c0_i32 : i32, i32, i32
  }
  func.func @transform_3(%arg0: i32, %arg1: i32) -> (i32, i32, i32) {
    %c0_i32 = arith.constant 0 : i32
    %c0_i32_0 = arith.constant 0 : i32
    %c0_i32_1 = arith.constant 0 : i32
    return %arg0, %c0_i32, %c0_i32_0 : i32, i32, i32
  }
  func.func @transform_4(%arg0: i32, %arg1: i32) -> (i32, i32, i32) {
    %c0_i32 = arith.constant 0 : i32
    %c0_i32_0 = arith.constant 0 : i32
    %c0_i32_1 = arith.constant 0 : i32
    return %arg0, %c0_i32, %c0_i32_0 : i32, i32, i32
  }
  func.func @transform_5(%arg0: i32, %arg1: i32) -> (i32, i32, i32) {
    %c0_i32 = arith.constant 0 : i32
    %c0_i32_0 = arith.constant 0 : i32
    return %arg0, %arg1, %c0_i32 : i32, i32, i32
  }
  func.func @transform_6(%arg0: i32, %arg1: i32) -> (i32, i32, i32) {
    %c0_i32 = arith.constant 0 : i32
    %c0_i32_0 = arith.constant 0 : i32
    return %arg0, %arg1, %c0_i32 : i32, i32, i32
  }
}

</mosaic_0001>

<bundles_post_ra>
// kernel: tpu_custom_call.1
= control target key start
LH: loop header
LB: loop body
LE: loop exit
PB: predicated region body
PF: predicated region fallthrough
CT: control target
= control target key end

     0   :  { %s1439_s0 = inlined_call_operand.vmem [shape: f32[2,8,16], index: 0, kind: input, shape index: {}]   ;;  %s1440_s1 = inlined_call_operand.vmem [shape: f32[2,16,8], index: 1, kind: input, shape index: {}]   ;;  %s1441_s2 = inlined_call_operand.vmem [shape: s32[2,16,2], index: 2, kind: input, shape index: {}]   ;;  %s1442_s3 = inlined_call_operand.hbm [shape: f32[2,8,16], index: 3, kind: output, shape index: {0}]   ;;  %s1443_s4 = inlined_call_operand.hbm [shape: f32[2,8,128], index: 4, kind: output, shape index: {1}]   ;;  %s1444_s5 = inlined_call_operand.vmem [shape: f32[2,16,8], index: 5, kind: output, shape index: {2}]   ;;  %s1445_s6 = inlined_call_operand.hbm [shape: f32[2,16,128], index: 6, kind: output, shape index: {3}]  }
   0x1   :  { %1448 = sst [smem:[#allocation10_spill]] %s1439_s0 }
   0x2   :  { %1449 = sst [smem:[#allocation11_spill]] %s1440_s1 }
   0x3   :  { %12 = vsyncpa [#allocation4], 0 }
   0x4   :  { %14 = vsyncpa [#allocation4 + $0x1], 0 }
   0x5   :  { %15 = vsyncpa [#allocation6], 0 }
   0x6   :  { %17 = vsyncpa [#allocation6 + $0x1], 0  ;;  %s1197_s21 = smov 0   ;;  %s1199_s22 = smov 0  }
   0x7   :  { %s1201_s23 = smov 0   ;;  %s1203_s24 = smov 0  }
   0x8   :  { %s1205_s25 = smov 0   ;;  %s1207_s26 = smov 0  }
   0x9 LB: > { %s892_s27 = sadd.s32 4294967295, %s1155_s26   ;;  %s1446_s28 = sadd.s32 4294967294, %s1155_s26   ;;  %s1155_s26 = sphi %s1207_s26, %s23_s26   ;;  %s1151_s25 = sphi %s1205_s25, %s1460_s25   ;;  %s1147_s24 = sphi %s1203_s24, %s1459_s24   ;;  %s1143_s23 = sphi %s1201_s23, %s1458_s23   ;;  %s1139_s22 = sphi %s1199_s22, %s1457_s22   ;;  %s1135_s21 = sphi %s1197_s21, %s1456_s21  }
   0xa   : > { %s35_s29 = sadd.s32 1, %s1151_s25  ;;  %s124_s30 = sadd.s32 1, %s1143_s23 }
   0xb   : > { %p37_p0 = scmp.ge.s32.totalorder %s35_s29, 2  ;;  %p134_p1 = scmp.ne.s32.totalorder %s1143_s23, %s1139_s22 }
   0xc   : > { %p135_p2 = scmp.eq.s32.totalorder %s892_s27, 1  ;;  %p140_p3 = scmp.ne.s32.totalorder %s1139_s22, %s1135_s21 }
   0xd   : > { %s1462_s29 = smov (%p37_p0, %s35_s29), 0  ;;  %p141_p5 = scmp.eq.s32.totalorder %s1446_s28, 1 }
   0xe   : > { %p1239_p4 = por %p135_p2, %p134_p1  ;;  %s121_s8 = ssub.s32 %s1151_s25, %s1462_s29 }
   0xf   : > { %p896_p6 = scmp.ge.s32.totalorder %s1155_s26, 1  ;;  %p122_p7 = scmp.eq.s32.totalorder %s121_s8, 0 }
  0x10   : > { %p1248_p8 = por %p141_p5, %p140_p3  ;;  %p274_p9 = scmp.lt.s32.totalorder %s1155_s26, 3 }
  0x11   : > { %s1254_s10 = scalar_select %p122_p7, %s1143_s23, %s124_s30  }
  0x12   : > { %p275_p10 = pnand %p896_p6, %p274_p9 }
  0x13   : > { %p340_p11 = scmp.lt.s32.totalorder (!%p275_p10), %s1147_s24, 1  ;;  %s1452_s0 = sld [smem:[#allocation10_spill]] (!%p275_p10) }
  0x14   : > { %278 = sbr.rel (%p275_p10) target bundleno = 938 (0x3aa), region = 32  ;;  %s1453_s1 = sld [smem:[#allocation11_spill]] (!%p275_p10) }
  0x15   : > { %s918_s18 = sshll.u32 (!%p275_p10), %s1147_s24, 3  ;;  %s1037_s20 = scalar_lea.hbm (!%p275_p10), %s1443_s4, 16 }
  0x16   : > { %s658_s30 = scalar_lea.hbm (!%p275_p10), %s1443_s4, %s918_s18 }
  0x19   : > { %s341_s11 = scalar_select %p340_p11, %s1147_s24, 1  ;;  %vm380_vm0 = vcmask 130048   ;;  %vm428_vm1 = vcmask 64512   ;;  %v1157_v4 = vmov 0   ;;  %v1158_v5 = vmov 1  }
  0x1a   : > { %1000 = vset.pattern.permute.xlu2 %v1157_v4  ;;  %1001 = vset.pattern.permute.xlu0 %v1157_v4  ;;  %v392_v18 = vlaneseq  ;;  %vm419_vm3 = vcmask 7168   ;;  %v1159_v48 = vmov 0.0  }
  0x1b   : > { %s900_s12 = sshll.u32 %s341_s11, 3  ;;  %s1262_s16 = sshll.u32 %s341_s11, 4  ;;  %1002 = vset.pattern.permute.xlu1 %v1158_v5 }
  0x1c   : > { %s343_s15 = scalar_lea.vmem %s1452_s0, %s900_s12  ;;  %s1268_s19 = scalar_lea.vmem %s1453_s1, %s1262_s16  ;;  %v1281_v20 = vand.u32 127, %v392_v18 }
  0x1d   : > { %v379_v0 = vld [vmem:[%s343_s15] sm:$0xff]  ;;  %v427_v2 = vld [vmem:[%s1268_s19 + $0x8] sm:$0xff]  ;;  %s362_s8 = scalar_lea.vmem %s1441_s2, %s1262_s16  ;;  %s1279_s11 = sand.u32 1, %s1139_s22  }
  0x1e   : > { %v381_v1 = vsel %vm380_vm0, %v379_v0, -inf  ;;  %v432_v3 = vsel %vm428_vm1, %v427_v2, -inf  ;;  %v502_v9 = vld [vmem:[%s362_s8 + $0x8] sm:$0xff]  ;;  %v501_v12 = vld [vmem:[%s362_s8] sm:$0xff]  ;;  %s897_s12 = sshll.u32 %s1279_s11, 3  ;;  %vm394_vm2 = vcmp.eq.s32.totalorder %v1281_v20, 0  ;;  %s1300_s17 = scalar_lea.vmem %s1444_s5, %s1262_s16 }
  0x1f   : > { %382 = vmax.xlane.f32.xlu0 %v381_v1  ;;  %433 = vmax.xlane.f32.xlu2 %v432_v3  ;;  %s1290_s13 = scalar_lea.vmem [#allocation3], %s897_s12  ;;  %v426_v25 = vld [vmem:[%s1268_s19] sm:$0xff]  ;;  %vm401_vm4 = vcmp.ge.s32.totalorder %v1281_v20, 1  ;;  %s321_s16 = scalar_lea.vmem [#allocation5], %s897_s12 }
  0x20   : > { %v429_v26 = vsel %vm428_vm1, %v426_v25, -inf  ;;  %s1358_s8 = sand.u32 1, %s892_s27   ;;  %s660_s14 = sshll.u32 %s321_s16, 4  ;;  %s661_s14 = int_to_ptr.vmem [resolvable:$true] %s660_s14 }
  0x21   : > { %s662_s12 = sshll.u32 %s658_s30, 4  ;;  %s1447_s15 = scalar_lea.sflag [#allocation6], %s1358_s8  ;;  %s663_s12 = int_to_ptr.hbm [resolvable:$true] %s662_s12 }
  0x37   : > { %507 = vperm.xlu2 %1000, %v502_v9  }
  0x3f   : > { %504 = vperm.xlu2 %1000, %v501_v12  }
  0x47   : > { %1003 = vset.pattern.permute.xlu2 %v1158_v5 }
  0x48   : > { %516 = vperm.xlu2 %1003, %v501_v12  }
  0x92   : > { %v383_v6 = vpop.xlane.xlu0 %382  ;;  %v434_v13 = vpop.xlane.xlu2 %433 }
  0x93   : > { %v384_v7 = vsub.f32 %v379_v0, %v383_v6  ;;  %v436_v14 = vsub.f32 %v427_v2, %v434_v13 }
  0x95   : > { %v385_v8 = vmul.f32 1.442695, %v384_v7  ;;  %v439_v15 = vmul.f32 1.442695, %v436_v14 }
  0x97   : > { %1005 = vpow2.f32 %v385_v8 }
  0x98   : > { %1007 = vpow2.f32 %v439_v15 }
  0x9a   : > { %v508_v27 = vpop.permute.xlu2 %507 }
  0x9b   : > { %vm510_vm7 = vcmp.eq.s32.totalorder %v1281_v20, %v508_v27 }
  0x9c   : > { %v908_v49 = vsel %vm510_vm7, 1.0, %v1159_v48 }
  0x9d   : > { %v1006_v10 = vpop.eup %1005 }
  0x9e   : > { %v387_v11 = vsel %vm380_vm0, %v1006_v10, 0.0  ;;  %v1008_v16 = vpop.eup %1007 }
  0x9f   : > { %388 = vadd.xlane.f32.xlu0 %v387_v11  ;;  %v444_v17 = vsel %vm428_vm1, %v1008_v16, 0.0 }
  0xa0   : > { %445 = vadd.xlane.f32.xlu2 %v444_v17 }
  0xa2   : > { %v505_v28 = vpop.permute.xlu2 %504 }
  0xa3   : > { %vm509_vm8 = vcmp.eq.s32.totalorder %v1281_v20, %v505_v28 }
  0xa4   : > { %v907_v50 = vsel %vm509_vm8, 1.0, %v1159_v48 }
  0xaa   : > { %v517_v29 = vpop.permute.xlu2 %516 }
  0xab   : > { %vm521_vm9 = vcmp.eq.s32.totalorder %v1281_v20, %v517_v29 }
  0xac   : > { %v909_v51 = vsel %vm521_vm9, 1.0, %v1159_v48 }
 0x112   : > { %v389_v19 = vpop.xlane.xlu0 %388 }
 0x113   : > { %1009 = vrcp.f32 %v389_v19  ;;  %v446_v30 = vpop.xlane.xlu2 %445 }
 0x114   : > { %1011 = vrcp.f32 %v446_v30 }
 0x119   : > { %v1010_v21 = vpop.eup %1009 }
 0x11a   : > { %v391_v22 = vmul.f32 %v1010_v21, %v1006_v10  ;;  %v1012_v31 = vpop.eup %1011 }
 0x11b   : > { %v450_v32 = vmul.f32 %v1012_v31, %v1008_v16 }
 0x11c   : > { %v395_v23 = vsel %vm394_vm2, 0.0, %v391_v22 }
 0x11d   : > { %v397_v24 = vsel %vm380_vm0, %v395_v23, -inf  ;;  %396 = vst.msk [vmem:[%s1290_s13] sm:$0xff] %vm380_vm0, %v395_v23  ;;  %v457_v44 = vsel %vm394_vm2, 0.0, %v450_v32 }
 0x11e   : > { %398 = vmax.xlane.f32.xlu1 %v397_v24  ;;  %452 = vst.msk [vmem:[%s1300_s17 + $0x8] sm:$0xff] %vm428_vm1, %v450_v32  ;;  %v461_v45 = vsel %vm428_vm1, %v457_v44, -inf }
 0x126   : > { %430 = vmax.xlane.f32.xlu1 %v429_v26 }
 0x13f   : > { %519 = vperm.xlu1 %1002, %v502_v9  }
 0x147   : > { %1004 = vset.pattern.permute.xlu1 %v1157_v4 }
 0x191   : > { %v1305_v33 = vpop.xlane.xlu1 %398 }
 0x192   : > { %vm400_vm5 = vcmp.eq.f32.partialorder %v395_v23, %v1305_v33  ;;  %420 = vst.msk [vmem:[#allocation2] sm:$0xff] %vm419_vm3, %v1305_v33 }
 0x193   : > { %vm402_vm6 = vmand %vm400_vm5, %vm401_vm4 }
 0x194   : > { %v403_v34 = vsel %vm402_vm6, %v1281_v20, 16 }
 0x195   : > { %v404_v35 = vsel %vm380_vm0, %v403_v34, 2147483647 }
 0x196   : > { %v406_v36 = vshra.s32 %v404_v35, 16  ;;  %v405_v63 = vand.u32 65535, %v404_v35 }
 0x198   : > { %v408_v37 = vcvt.s32.f32 %v406_v36  ;;  %v407_v1 = vcvt.s32.f32 %v405_v63 }
 0x199   : > { %v431_v38 = vpop.xlane.xlu1 %430  ;;  %v527_v39 = vld [vmem:[#allocation2] sm:$0xff] }
 0x19a   : > { %v435_v40 = vsub.f32 %v426_v25, %v431_v38  ;;  %530 = vperm.xlu0 %1001, %v527_v39   ;;  %409 = vmin.xlane.f32.xlu2 %v408_v37 }
 0x19c   : > { %v437_v41 = vmul.f32 1.442695, %v435_v40 }
 0x19e   : > { %1013 = vpow2.f32 %v437_v41 }
 0x1a4   : > { %v1014_v42 = vpop.eup %1013 }
 0x1a5   : > { %v441_v43 = vsel %vm428_vm1, %v1014_v42, 0.0 }
 0x1a6   : > { %442 = vadd.xlane.f32.xlu1 %v441_v43 }
 0x1ae   : > { %462 = vmax.xlane.f32.xlu1 %v461_v45 }
 0x1b1   : > { %v520_v46 = vpop.permute.xlu1 %519 }
 0x1b2   : > { %vm522_vm10 = vcmp.eq.s32.totalorder %v1281_v20, %v520_v46 }
 0x1b3   : > { %v910_v52 = vsel %vm522_vm10, 1.0, %v1159_v48 }
 0x20c   : > { %v531_v47 = vpop.permute.xlu0 %530 }
 0x20d   : > { %554 = vmatpush.msra.mxu0 %v531_v47  ;;  %928 = vmatpush.msra.mxu2 %v531_v47  ;;  %v410_v61 = vpop.xlane.xlu2 %409 }
 0x20e   : > { %583 = vmatpush.msra.mxu1 %v531_v47  ;;  %929 = vmatpush.msra.mxu3 %v531_v47  ;;  %vm411_vm13 = vcmp.eq.f32.partialorder %v408_v37, %v410_v61  ;;  %v416_v11 = vcvt.f32.s32 %v410_v61 }
 0x20f   : > { %911 = vmatmul.msk.f32.vlgmr.msra.gmra.mxu0 %vm428_vm1, %v907_v50  ;;  %912 = vmatmul.msk.f32.vlgmr.msra.gmra.mxu2 %vm428_vm1, %v908_v49  ;;  %v412_v2 = vsel %vm411_vm13, %v407_v1, inf }
 0x210   : > { %913 = vmatmul.msk.f32.vlgmr.msra.gmra.mxu1 %vm428_vm1, %v909_v51  ;;  %914 = vmatmul.msk.f32.vlgmr.msra.gmra.mxu3 %vm428_vm1, %v910_v52  ;;  %v417_v18 = vshll.u32 %v416_v11, 16 }
 0x219   : > { %v443_v53 = vpop.xlane.xlu1 %442 }
 0x21a   : > { %1015 = vrcp.f32 %v443_v53 }
 0x220   : > { %v1016_v54 = vpop.eup %1015 }
 0x221   : > { %v1325_v55 = vpop.xlane.xlu1 %462  ;;  %v449_v56 = vmul.f32 %v1016_v54, %v1014_v42 }
 0x222   : > { %vm465_vm11 = vcmp.eq.f32.partialorder %v457_v44, %v1325_v55 }
 0x223   : > { %vm468_vm12 = vmand %vm465_vm11, %vm401_vm4  ;;  %v456_v57 = vsel %vm394_vm2, 0.0, %v449_v56  ;;  %451 = vst.msk [vmem:[%s1300_s17] sm:$0xff] %vm428_vm1, %v449_v56  ;;  %s1031_s17 = sshra.s32 %s663_s12, 4  ;;  %s1032_s17 = int_to_ptr.hbm [resolvable:$true] %s1031_s17 }
 0x224   : > { %v470_v58 = vsel %vm468_vm12, %v1281_v20, 8  ;;  %v458_v59 = vsel %vm428_vm1, %v456_v57, -inf  ;;  %s1033_s28 = scalar_lea.hbm %s1032_s17, 8  ;;  %p1038_p1 = scmp.lt.s32.totalorder %s1032_s17, %s1443_s4 }
 0x225   : > { %459 = vmax.xlane.f32.xlu0 %v458_v59  ;;  %v486_v60 = vsel %vm428_vm1, %v470_v58, 2147483647  ;;  %p1034_p12 = scmp.ne.s32.totalorder %s1032_s17, %s1033_s28  ;;  %p1039_p2 = scmp.lt.s32.totalorder %s1037_s20, %s1033_s28 }
 0x226   : > { %v488_v62 = vshra.s32 %v486_v60, 16  ;;  %v487_v6 = vand.u32 65535, %v486_v60 }
 0x227   : > { %p1035_p13 = pnand %p1034_p12, %p1239_p4  ;;  %p1040_p3 = por %p1039_p2, %p1038_p1 }
 0x228   : > { %v490_v0 = vcvt.s32.f32 %v488_v62  ;;  %v489_v13 = vcvt.s32.f32 %v487_v6 }
 0x229   : > { %p1036_p0 = pneg %p1035_p13 }
 0x22a   : > { %491 = vmin.xlane.f32.xlu2 %v490_v0 }
 0x22b   : > { %p1041_p5 = pnand %p1040_p3, %p1036_p0 }
 0x22d   : > { %413 = vmin.xlane.f32.xlu0 %v412_v2 }
 0x28c   : > { %v556_v3 = vpop.f32.mrf.mxu0 }
 0x28d   : > { %v585_v7 = vpop.f32.mrf.mxu1 }
 0x292   : > { %v559_v29 = vpop.f32.mrf.mxu2 }
 0x298   : > { %v460_v4 = vpop.xlane.xlu0 %459 }
 0x299   : > { %vm464_vm14 = vcmp.eq.f32.partialorder %v456_v57, %v460_v4  ;;  %v591_v5 = vmul.f32 %v556_v3, %v460_v4 }
 0x29a   : > { %vm467_vm15 = vmand %vm464_vm14, %vm401_vm4 }
 0x29b   : > { %v469_v8 = vsel %vm467_vm15, %v1281_v20, 8  ;;  %v593_v9 = vmul.f32 %v591_v5, %v585_v7 }
 0x29c   : > { %v471_v10 = vsel %vm428_vm1, %v469_v8, 2147483647  ;;  %vm421_vm1 = vcmp.eq.s32.totalorder %v1281_v20, 1 }
 0x29d   : > { %600 = vperm.xlu0 %1001, %v593_v9   ;;  %v1341_v12 = vpop.xlane.xlu2 %491  ;;  %v473_v14 = vshra.s32 %v471_v10, 16  ;;  %v472_v25 = vand.u32 65535, %v471_v10 }
 0x29e   : > { %vm493_vm0 = vcmp.eq.f32.partialorder %v490_v0, %v1341_v12 }
 0x29f   : > { %v494_v15 = vsel %vm493_vm0, %v489_v13, inf  ;;  %v475_v16 = vcvt.s32.f32 %v473_v14  ;;  %v474_v27 = vcvt.s32.f32 %v472_v25 }
 0x2a0   : > { %v414_v17 = vpop.xlane.xlu0 %413  ;;  %495 = vmin.xlane.f32.xlu2 %v494_v15 }
 0x2a1   : > { %v415_v19 = vcvt.f32.s32 %v414_v17  ;;  %476 = vmin.xlane.f32.xlu1 %v475_v16 }
 0x2a3   : > { %v418_v21 = vadd.s32 %v417_v18, %v415_v19 }
 0x2a5   : > { %v422_v22 = vcvt.s32.f32 %v418_v21 }
 0x2a7   : > { %v423_v23 = vsel %vm421_vm1, %v422_v22, 0.0 }
 0x2a8   : > { %v424_v24 = vsel %vm394_vm2, %v1305_v33, %v423_v23 }
 0x2a9   : > { %425 = vst [vmem:[%s321_s16] sm:$0xff] %v424_v24 }
 0x314   : > { %v477_v26 = vpop.xlane.xlu1 %476 }
 0x315   : > { %vm478_vm3 = vcmp.eq.f32.partialorder %v475_v16, %v477_v26 }
 0x316   : > { %v479_v28 = vsel %vm478_vm3, %v474_v27, inf }
 0x317   : > { %480 = vmin.xlane.f32.xlu1 %v479_v28 }
 0x318   : > { %1044 = shalt.err (!%p1041_p5)
}
 0x319   : > { %931 = dma.vmem_to_hbm [thread:$0]  (%p1239_p4), %s661_s14, 128, %s663_s12, %s1447_s15   ;;  %v592_v30 = vmul.f32 %v559_v29, %v1325_v55  ;;  %v588_v31 = vpop.f32.mrf.mxu3 }
 0x31a   : > { %s644_s30 = scalar_lea.hbm %s1442_s3, %s918_s18  ;;  %s646_s1 = sshll.u32 %s1290_s13, 4  ;;  %s647_s1 = int_to_ptr.vmem [resolvable:$true] %s646_s1 }
 0x31b   : > { %s648_s17 = sshll.u32 %s644_s30, 4  ;;  %s615_s28 = scalar_lea.sflag [#allocation4], %s1279_s11  ;;  %s649_s17 = int_to_ptr.hbm [resolvable:$true] %s648_s17 }
 0x31c   : > { %s1059_s19 = sshra.s32 %s649_s17, 4  ;;  %s1065_s27 = scalar_lea.hbm %s1442_s3, 16  ;;  %s1060_s19 = int_to_ptr.hbm [resolvable:$true] %s1059_s19 }
 0x31d   : > { %s1061_s20 = scalar_lea.hbm %s1060_s19, 8  ;;  %p1066_p10 = scmp.lt.s32.totalorder %s1060_s19, %s1442_s3 }
 0x31e   : > { %p1062_p6 = scmp.ne.s32.totalorder %s1060_s19, %s1061_s20  ;;  %p1067_p11 = scmp.lt.s32.totalorder %s1065_s27, %s1061_s20 }
 0x320   : > { %p1063_p7 = pnand %p1062_p6, %p1239_p4  ;;  %p1068_p12 = por %p1067_p11, %p1066_p10 }
 0x322   : > { %p1064_p9 = pneg %p1063_p7 }
 0x324   : > { %p1069_p13 = pnand %p1068_p12, %p1064_p9 }
 0x326   : > { %1072 = shalt.err (!%p1069_p13)
}
 0x327   : > { %930 = dma.vmem_to_hbm [thread:$0]  (%p1239_p4), %s647_s1, 128, %s649_s17, %s615_s28   ;;  %v594_v32 = vmul.f32 %v592_v30, %v588_v31  ;;  %v483_v33 = vcvt.f32.s32 %v477_v26  ;;  %v601_v37 = vpop.permute.xlu0 %600  ;;  %v496_v42 = vpop.xlane.xlu2 %495  ;;  %v498_v43 = vcvt.f32.s32 %v1341_v12 }
 0x328   : > { %s899_s13 = sshll.u32 %s1279_s11, 4  ;;  %v608_v40 = vsel %vm421_vm1, %v601_v37, 0.0  ;;  %v497_v44 = vcvt.f32.s32 %v496_v42  ;;  %s927_s15 = sshll.u32 %s1147_s24, 4 }
 0x329   : > { %v484_v35 = vshll.u32 %v483_v33, 16  ;;  %s339_s18 = scalar_lea.vmem [#allocation7], %s899_s13  ;;  %v499_v45 = vshll.u32 %v498_v43, 16  ;;  %s679_s11 = scalar_lea.hbm %s1445_s6, %s927_s15 }
 0x32a   : > { %s680_s1 = sshll.u32 %s339_s18, 4  ;;  %s682_s17 = sshll.u32 %s679_s11, 4  ;;  %s681_s1 = int_to_ptr.vmem [resolvable:$true] %s680_s1  ;;  %s683_s17 = int_to_ptr.hbm [resolvable:$true] %s682_s17 }
 0x32b   : > { %v500_v46 = vadd.s32 %v499_v45, %v497_v44  ;;  %s1087_s24 = sshra.s32 %s683_s17, 4  ;;  %s1093_s14 = scalar_lea.hbm %s1445_s6, 32  ;;  %s1088_s24 = int_to_ptr.hbm [resolvable:$true] %s1087_s24 }
 0x32c   : > { %s1089_s28 = scalar_lea.hbm %s1088_s24, 16  ;;  %p1094_p3 = scmp.lt.s32.totalorder %s1088_s24, %s1445_s6 }
 0x32d   : > { %v596_v47 = vcvt.s32.f32 %v500_v46  ;;  %p1090_p0 = scmp.ne.s32.totalorder %s1088_s24, %s1089_s28  ;;  %p1095_p5 = scmp.lt.s32.totalorder %s1093_s14, %s1089_s28 }
 0x32f   : > { %p1091_p1 = pnand %p1090_p0, %p1239_p4  ;;  %p1096_p6 = por %p1095_p5, %p1094_p3 }
 0x330   : > { %605 = vperm.xlu1 %1004, %v594_v32  }
 0x331   : > { %p1092_p2 = pneg %p1091_p1 }
 0x333   : > { %p1097_p7 = pnand %p1096_p6, %p1092_p2 }
 0x38a   : > { %v481_v34 = vpop.xlane.xlu1 %480 }
 0x38b   : > { %v482_v36 = vcvt.f32.s32 %v481_v34 }
 0x38d   : > { %v485_v38 = vadd.s32 %v484_v35, %v482_v36 }
 0x38f   : > { %v595_v39 = vcvt.s32.f32 %v485_v38 }
 0x391   : > { %v610_v41 = vsel %vm394_vm2, %v595_v39, %v608_v40 }
 0x392   : > { %612 = vst [vmem:[%s339_s18] sm:$0xff] %v610_v41 }
 0x3a2   : > { %v606_v48 = vpop.permute.xlu1 %605 }
 0x3a3   : > { %v609_v49 = vsel %vm421_vm1, %v606_v48, 0.0 }
 0x3a4   : > { %v611_v50 = vsel %vm394_vm2, %v596_v47, %v609_v49 }
 0x3a5   : > { %613 = vst [vmem:[%s339_s18 + $0x8] sm:$0xff] %v611_v50 }
 0x3a6   : > { %1100 = shalt.err (!%p1097_p7)
}
 0x3a7   : > { %s1160_s0 = smov 128   ;;  %s1161_s13 = smov 8  }
 0x3a8   : > { %s1454_s18 = scalar_lea.sflag [#allocation6], %s1358_s8 }
 0x3a9   : > { %932 = dma.vmem_to_hbm [thread:$0]  (%p1239_p4), %s681_s1, 256, %s683_s17, %s1454_s18, %s1160_s0, %s1160_s0, %s1161_s13  }
 0x3aa PF: > { %p946_p9 = scmp.ge.s32.totalorder %s1155_s26, 2  ;;  %s697_s15 = sand.u32 1, %s1135_s21  }
 0x3ab   : > { %s698_s16 = scalar_lea.sflag [#allocation4], %s697_s15 }
 0x3ac   : > { %p937_p10 = pnand %p946_p9, %p1248_p8 }
 0x3ae   : > { %p938_p11 = pneg %p937_p10 }
 0x3b0   : > { %1126 = dma.done.wait (%p938_p11), %s698_s16, 128  }
 0x3b1   : > { %1128 = vsyncadd (%p938_p11), %s698_s16, 4294967168  ;;  %s1455_s30 = sadd.s32 4294967294, %s1155_s26  }
 0x3b2   : > { %s707_s11 = sand.u32 1, %s1455_s30  }
 0x3b3   : > { %s708_s24 = scalar_lea.sflag [#allocation6], %s707_s11 }
 0x3b4   : > { %1130 = dma.done.wait (%p938_p11), %s708_s24, 384  }
 0x3b5   : > { %1132 = vsyncadd (%p938_p11), %s708_s24, 4294966912  ;;  %s23_s26 = sadd.s32 1, %s1155_s26   ;;  %s1456_s21 = smov %s1139_s22 }
 0x3b6   : > { %p20_p4 = scmp.ge.s32.totalorder %s23_s26, 4   ;;  %s1457_s22 = smov %s1143_s23 }
 0x3b7   : > { %s1458_s23 = smov %s1254_s10  ;;  %s1459_s24 = smov %s1151_s25 }
 0x3b8   : > { %s1460_s25 = smov %s1462_s29  ;;  %22 = sbr.rel (!%p20_p4) target bundleno = 9 (0x9), region = 121 }
 0x3bd   :  { %736 = vsyncpa [#allocation4], 1 }
 0x3be   :  { %738 = vsyncpa [#allocation4 + $0x1], 1 }
 0x3bf   :  { %739 = vsyncpa [#allocation6], 1 }
 0x3c0   :  { %741 = vsyncpa [#allocation6 + $0x1], 1 }

</bundles_post_ra>
